<compile_context>
chip_gen: v7x
topology: tpu7x:2x2x1
jax: 0.10.0
libtpu: 0.0.40
codegen_flags: <defaults>
</compile_context>

<pallas_src>
import jax
import jax.numpy as jnp
from jax.experimental import pallas as pl
from jax.experimental.pallas import tpu as pltpu


def _round_up(x, m):
    return (x + m - 1) // m * m


def autoencoder_kernel(x_ref, we_ref, be_ref, wd_ref, bd_ref, o_ref):
    # --- encoder: Linear + ReLU (bf16 MXU operands, f32 accumulation) ---
    x = x_ref[...]
    h = jnp.dot(x, we_ref[...], preferred_element_type=jnp.float32)
    h = jnp.maximum(h + be_ref[...], 0.0)            # bias + ReLU in f32 (VPU)

    # --- decoder: Linear + Sigmoid ---
    # Intentional downcast of activations to the decoder-weight dtype (bf16 on
    # the fast path) so the second matmul also runs at MXU bf16 rate.
    y = jnp.dot(h.astype(wd_ref.dtype), wd_ref[...],
                preferred_element_type=jnp.float32)
    y = jax.nn.sigmoid(y + bd_ref[...])              # f32 sigmoid (EUP exp)

    o_ref[...] = y.astype(o_ref.dtype)


def autoencoder_forward(x, w_enc, b_enc, w_dec, b_dec, *, tb=512, use_bf16=True):
    B, D = x.shape
    H = w_enc.shape[1]
    out_dtype = x.dtype

    compute_dtype = jnp.bfloat16 if use_bf16 else x.dtype
    xc = x.astype(compute_dtype)
    we = w_enc.astype(compute_dtype)
    wd = w_dec.astype(compute_dtype)
    be = b_enc.reshape(1, H).astype(jnp.float32)
    bd = b_dec.reshape(1, D).astype(jnp.float32)

    # Batch tile: big enough to fill the MXU M-dim, no bigger than the batch
    # itself (8-row aligned), always a multiple of 8 for the (8,128) layout.
    tb = _round_up(max(8, min(tb, _round_up(B, 8))), 8)
    B_pad = _round_up(B, tb)
    if B_pad != B:
        xc = jnp.pad(xc, ((0, B_pad - B), (0, 0)))

    # Explicit VMEM budget: double-buffered x / out tiles, (double-buffered)
    # resident weights and biases, plus headroom. Clamp well under 128 MiB so
    # the same config stays valid on v7x's 64 MiB VMEM for these sizes.
    in_item = jnp.dtype(compute_dtype).itemsize
    out_item = jnp.dtype(out_dtype).itemsize
    vmem_bytes = (
        2 * tb * D * in_item            # x tiles (double-buffered)
        + 2 * tb * D * out_item         # out tiles (double-buffered)
        + 2 * (D * H + H * D) * in_item # encoder + decoder weights
        + 2 * (H + D) * 4               # biases (f32)
        + (8 << 20)                     # headroom
    )
    vmem_bytes = int(min(vmem_bytes, 100 << 20))

    grid = (B_pad // tb,)
    out = pl.pallas_call(
        autoencoder_kernel,
        out_shape=jax.ShapeDtypeStruct((B_pad, D), out_dtype),
        grid_spec=pltpu.PrefetchScalarGridSpec(
            num_scalar_prefetch=0,
            grid=grid,
            in_specs=[
                pl.BlockSpec((tb, D), lambda i: (i, 0)),   # x tile
                pl.BlockSpec((D, H), lambda i: (0, 0)),    # encoder weight (resident)
                pl.BlockSpec((1, H), lambda i: (0, 0)),    # encoder bias
                pl.BlockSpec((H, D), lambda i: (0, 0)),    # decoder weight (resident)
                pl.BlockSpec((1, D), lambda i: (0, 0)),    # decoder bias
            ],
            out_specs=pl.BlockSpec((tb, D), lambda i: (i, 0)),
        ),
        compiler_params=pltpu.CompilerParams(
            dimension_semantics=("parallel",),
            vmem_limit_bytes=vmem_bytes,
        ),
    )(xc, we, be, wd, bd)

    # TODO(synk): for very large D*H (weights no longer VMEM-resident, esp. on
    # v7x's 64 MiB) add K/N grid axes with an f32 accumulator scratch.
    return out[:B] if B_pad != B else out


def reference_forward(x, w_enc, b_enc, w_dec, b_dec, *, use_bf16=True):
    cd = jnp.bfloat16 if use_bf16 else x.dtype
    h = jnp.dot(x.astype(cd), w_enc.astype(cd),
                preferred_element_type=jnp.float32)
    h = jnp.maximum(h + b_enc.reshape(1, -1).astype(jnp.float32), 0.0)
    y = jnp.dot(h.astype(cd), w_dec.astype(cd),
                preferred_element_type=jnp.float32)
    y = jax.nn.sigmoid(y + b_dec.reshape(1, -1).astype(jnp.float32))
    return y.astype(x.dtype)


if __name__ == "__main__":
    # Small MLP-autoencoder shapes: batch=12 (not tile-divisible, exercises
    # the padding path), D=256 features, H=128 hidden.
    B, D, H = 12, 256, 128

    key = jax.random.PRNGKey(0)
    kx, kwe, kbe, kwd, kbd = jax.random.split(key, 5)

    x = jax.random.normal(kx, (B, D), dtype=jnp.float32)
    # Deterministic parameter init (uniform, roughly PyTorch Linear scale)
    w_enc = jax.random.uniform(kwe, (D, H), jnp.float32, -1.0, 1.0) / jnp.sqrt(D)
    b_enc = jax.random.uniform(kbe, (1, H), jnp.float32, -1.0, 1.0) / jnp.sqrt(D)
    w_dec = jax.random.uniform(kwd, (H, D), jnp.float32, -1.0, 1.0) / jnp.sqrt(H)
    b_dec = jax.random.uniform(kbd, (1, D), jnp.float32, -1.0, 1.0) / jnp.sqrt(H)

    # f32 path: exact match against the f32 reference.
    out_f32 = autoencoder_forward(x, w_enc, b_enc, w_dec, b_dec, use_bf16=False)
    out_f32 = jax.block_until_ready(out_f32)
    ref_f32 = reference_forward(x, w_enc, b_enc, w_dec, b_dec, use_bf16=False)
    assert out_f32.shape == (B, D)
    assert jnp.allclose(out_f32, ref_f32, atol=1e-5, rtol=1e-5)

    # bf16 fast path (default): compare against a matched-precision reference.
    out_bf16 = autoencoder_forward(x, w_enc, b_enc, w_dec, b_dec, use_bf16=True)
    out_bf16 = jax.block_until_ready(out_bf16)
    ref_bf16 = reference_forward(x, w_enc, b_enc, w_dec, b_dec, use_bf16=True)
    assert out_bf16.shape == (B, D)
    assert jnp.allclose(out_bf16, ref_bf16, atol=1e-2, rtol=1e-2)

    print("KERNEL_OK")
</pallas_src>

<mosaic_0001>
module attributes {stable_mosaic.version = 11 : i64} {
  func.func @autoencoder_kernel(%arg0: i32, %arg1: memref<16x256xf32, #tpu.memory_space<vmem>>, %arg2: memref<256x128xf32, #tpu.memory_space<vmem>>, %arg3: memref<1x128xf32, #tpu.memory_space<vmem>>, %arg4: memref<128x256xf32, #tpu.memory_space<vmem>>, %arg5: memref<1x256xf32, #tpu.memory_space<vmem>>, %arg6: memref<16x256xf32, #tpu.memory_space<vmem>>) attributes {dimension_semantics = [#tpu.dimension_semantics<parallel>], iteration_bounds = array<i64: 1>, scalar_prefetch = 0 : i64, scratch_operands = 0 : i64, tpu.core_type = #tpu.core_type<tc>, window_params = [{transform_indices = @transform_0, window_bounds = array<i64: 16, 256>}, {pipeline_mode = #tpu.pipeline_mode<synchronous>, transform_indices = @transform_1, window_bounds = array<i64: 256, 128>}, {pipeline_mode = #tpu.pipeline_mode<synchronous>, transform_indices = @transform_2, window_bounds = array<i64: 1, 128>}, {pipeline_mode = #tpu.pipeline_mode<synchronous>, transform_indices = @transform_3, window_bounds = array<i64: 128, 256>}, {pipeline_mode = #tpu.pipeline_mode<synchronous>, transform_indices = @transform_4, window_bounds = array<i64: 1, 256>}, {transform_indices = @transform_5, window_bounds = array<i64: 16, 256>}]} {
    %c0 = arith.constant 0 : index
    %c0_0 = arith.constant 0 : index
    %0 = vector.load %arg1[%c0, %c0_0] : memref<16x256xf32, #tpu.memory_space<vmem>>, vector<16x256xf32>
    %c0_1 = arith.constant 0 : index
    %c0_2 = arith.constant 0 : index
    %1 = vector.load %arg2[%c0_1, %c0_2] : memref<256x128xf32, #tpu.memory_space<vmem>>, vector<256x128xf32>
    %cst = arith.constant dense<0.000000e+00> : vector<16x128xf32>
    %2 = tpu.matmul %0, %1, %cst {dimension_numbers = #tpu.dot_dimension_numbers<[1], [0], [0], [1], [0, 0, 1, 1], [], []>} : vector<16x256xf32>, vector<256x128xf32>, vector<16x128xf32> -> vector<16x128xf32>
    %c0_3 = arith.constant 0 : index
    %c0_4 = arith.constant 0 : index
    %3 = vector.load %arg3[%c0_3, %c0_4] : memref<1x128xf32, #tpu.memory_space<vmem>>, vector<1x128xf32>
    %4 = vector.broadcast %3 : vector<1x128xf32> to vector<16x128xf32>
    %5 = arith.addf %2, %4 : vector<16x128xf32>
    %cst_5 = arith.constant 0.000000e+00 : f32
    %6 = vector.broadcast %cst_5 : f32 to vector<16x128xf32>
    %7 = arith.maximumf %5, %6 : vector<16x128xf32>
    %c0_6 = arith.constant 0 : index
    %c0_7 = arith.constant 0 : index
    %8 = vector.load %arg4[%c0_6, %c0_7] : memref<128x256xf32, #tpu.memory_space<vmem>>, vector<128x256xf32>
    %cst_8 = arith.constant dense<0.000000e+00> : vector<16x256xf32>
    %9 = tpu.matmul %7, %8, %cst_8 {dimension_numbers = #tpu.dot_dimension_numbers<[1], [0], [0], [1], [0, 0, 1, 1], [], []>} : vector<16x128xf32>, vector<128x256xf32>, vector<16x256xf32> -> vector<16x256xf32>
    %c0_9 = arith.constant 0 : index
    %c0_10 = arith.constant 0 : index
    %10 = vector.load %arg5[%c0_9, %c0_10] : memref<1x256xf32, #tpu.memory_space<vmem>>, vector<1x256xf32>
    %11 = vector.broadcast %10 : vector<1x256xf32> to vector<16x256xf32>
    %12 = arith.addf %9, %11 : vector<16x256xf32>
    %13 = arith.negf %12 : vector<16x256xf32>
    %14 = math.exp %13 : vector<16x256xf32>
    %cst_11 = arith.constant 1.000000e+00 : f32
    %15 = vector.broadcast %cst_11 : f32 to vector<16x256xf32>
    %16 = arith.addf %15, %14 : vector<16x256xf32>
    %17 = arith.divf %15, %16 : vector<16x256xf32>
    %c0_12 = arith.constant 0 : index
    %c0_13 = arith.constant 0 : index
    %18 = vector.load %arg6[%c0_12, %c0_13] : memref<16x256xf32, #tpu.memory_space<vmem>>, vector<16x256xf32>
    tpu.vector_store %arg6[%c0_12, %c0_13], %17 {strides = array<i32>} : memref<16x256xf32, #tpu.memory_space<vmem>>, vector<16x256xf32>,
    return
  }
  func.func @transform_0(%arg0: i32) -> (i32, i32) {
    %c0_i32 = arith.constant 0 : i32
    %c0_i32_0 = arith.constant 0 : i32
    return %arg0, %c0_i32 : i32, i32
  }
  func.func @transform_1(%arg0: i32) -> (i32, i32) {
    %c0_i32 = arith.constant 0 : i32
    %c0_i32_0 = arith.constant 0 : i32
    %c0_i32_1 = arith.constant 0 : i32
    return %c0_i32, %c0_i32_0 : i32, i32
  }
  func.func @transform_2(%arg0: i32) -> (i32, i32) {
    %c0_i32 = arith.constant 0 : i32
    %c0_i32_0 = arith.constant 0 : i32
    %c0_i32_1 = arith.constant 0 : i32
    return %c0_i32, %c0_i32_0 : i32, i32
  }
  func.func @transform_3(%arg0: i32) -> (i32, i32) {
    %c0_i32 = arith.constant 0 : i32
    %c0_i32_0 = arith.constant 0 : i32
    %c0_i32_1 = arith.constant 0 : i32
    return %c0_i32, %c0_i32_0 : i32, i32
  }
  func.func @transform_4(%arg0: i32) -> (i32, i32) {
    %c0_i32 = arith.constant 0 : i32
    %c0_i32_0 = arith.constant 0 : i32
    %c0_i32_1 = arith.constant 0 : i32
    return %c0_i32, %c0_i32_0 : i32, i32
  }
  func.func @transform_5(%arg0: i32) -> (i32, i32) {
    %c0_i32 = arith.constant 0 : i32
    %c0_i32_0 = arith.constant 0 : i32
    return %arg0, %c0_i32 : i32, i32
  }
}

</mosaic_0001>

<bundles_post_ra>
// kernel: tpu_custom_call.1
= control target key start
LH: loop header
LB: loop body
LE: loop exit
PB: predicated region body
PF: predicated region fallthrough
CT: control target
= control target key end

     0   :  { %10 = vsyncpa [#allocation3], 0  ;;  %s677_s0 = inlined_call_operand.hbm [shape: f32[16,256], index: 0, kind: input, shape index: {}]   ;;  %s678_s1 = inlined_call_operand.hbm [shape: f32[256,128], index: 1, kind: input, shape index: {}]   ;;  %s679_s2 = inlined_call_operand.vmem [shape: f32[1,128], index: 2, kind: input, shape index: {}]   ;;  %s680_s3 = inlined_call_operand.hbm [shape: f32[128,256], index: 3, kind: input, shape index: {}]   ;;  %s681_s4 = inlined_call_operand.vmem [shape: f32[1,256], index: 4, kind: input, shape index: {}]   ;;  %s682_s5 = inlined_call_operand.hbm [shape: f32[16,256], index: 5, kind: output, shape index: {}]  }
   0x1   :  { %11 = vsyncpa [#allocation6], 0 }
   0x2   :  { %12 = vsyncpa [#allocation4], 0  ;;  %s575_s18 = smov [#allocation5]   ;;  %s481_s22 = scalar_lea.hbm %s678_s1, 4096 }
   0x3   :  { %s30_s19 = sshll.u32 %s575_s18, 4  ;;  %p482_p0 = scmp.ne.s32.totalorder %s678_s1, %s481_s22  ;;  %s31_s19 = int_to_ptr.vmem [resolvable:$true] %s30_s19 }
   0x4   :  { %p485_p1 = scmp.lt.u32.totalorder %s481_s22, %s678_s1 }
   0x6   :  { %p487_p2 = pnand %p485_p1, %p482_p0 }
   0x8   :  { %490 = shalt.err (!%p487_p2)
}
   0x9   :  { %s491_s27 = scalar_lea.vmem %s31_s19, 4096  ;;  %p496_p4 = scmp.lt.s32.totalorder %s31_s19, %s31_s19 }
   0xa   :  { %p492_p3 = scmp.ne.s32.totalorder %s31_s19, %s491_s27  ;;  %p497_p5 = scmp.lt.s32.totalorder %s491_s27, %s491_s27 }
   0xc   :  { %p498_p6 = por %p497_p5, %p496_p4 }
   0xe   :  { %p499_p7 = pnand %p498_p6, %p492_p3 }
  0x10   :  { %502 = shalt.err (!%p499_p7)
}
  0x11   :  { %s576_s28 = smov 128   ;;  %s577_s29 = smov 8  }
  0x12   :  { %36 = dma.hbm_to_vmem [thread:$0]  %s678_s1, 4096, %s31_s19, [#allocation6], %s576_s28, %s576_s28, %s577_s29  }
  0x13   :  { %s578_s7 = smov [#allocation2]   ;;  %s503_s11 = scalar_lea.hbm %s677_s0, 512 }
  0x14   :  { %s18_s8 = sshll.u32 %s578_s7, 4  ;;  %p504_p8 = scmp.ne.s32.totalorder %s677_s0, %s503_s11  ;;  %s19_s8 = int_to_ptr.vmem [resolvable:$true] %s18_s8 }
  0x15   :  { %p507_p9 = scmp.lt.u32.totalorder %s503_s11, %s677_s0 }
  0x17   :  { %p509_p10 = pnand %p507_p9, %p504_p8 }
  0x19   :  { %512 = shalt.err (!%p509_p10)
}
  0x1a   :  { %s513_s16 = scalar_lea.vmem %s19_s8, 512  ;;  %p518_p12 = scmp.lt.s32.totalorder %s19_s8, %s19_s8 }
  0x1b   :  { %p514_p11 = scmp.ne.s32.totalorder %s19_s8, %s513_s16  ;;  %p519_p13 = scmp.lt.s32.totalorder %s513_s16, %s513_s16 }
  0x1d   :  { %p520_p0 = por %p519_p13, %p518_p12 }
  0x1f   :  { %p521_p1 = pnand %p520_p0, %p514_p11 }
  0x21   :  { %524 = shalt.err (!%p521_p1)
}
  0x22   :  { %s579_s1 = smov 256   ;;  %s580_s17 = smov 16  }
  0x23   :  { %24 = dma.hbm_to_vmem [thread:$0]  %s677_s0, 512, %s19_s8, [#allocation3], %s579_s1, %s579_s1, %s580_s17  }
  0x24   :  { %s581_s20 = smov [#allocation7]   ;;  %s525_s24 = scalar_lea.hbm %s680_s3, 4096 }
  0x25   :  { %s44_s21 = sshll.u32 %s581_s20, 4  ;;  %p526_p2 = scmp.ne.s32.totalorder %s680_s3, %s525_s24  ;;  %s45_s21 = int_to_ptr.vmem [resolvable:$true] %s44_s21 }
  0x26   :  { %p529_p3 = scmp.lt.u32.totalorder %s525_s24, %s680_s3 }
  0x28   :  { %p531_p4 = pnand %p529_p3, %p526_p2 }
  0x2a   :  { %534 = shalt.err (!%p531_p4)
}
  0x2b   :  { %s535_s29 = scalar_lea.vmem %s45_s21, 4096  ;;  %p540_p6 = scmp.lt.s32.totalorder %s45_s21, %s45_s21 }
  0x2c   :  { %p536_p5 = scmp.ne.s32.totalorder %s45_s21, %s535_s29  ;;  %p541_p7 = scmp.lt.s32.totalorder %s535_s29, %s535_s29 }
  0x2e   :  { %p542_p8 = por %p541_p7, %p540_p6 }
  0x30   :  { %p543_p9 = pnand %p542_p8, %p536_p5 }
  0x32   :  { %546 = shalt.err (!%p543_p9)
}
  0x33   :  { %50 = dma.hbm_to_vmem [thread:$0]  %s680_s3, 4096, %s45_s21, [#allocation6], %s579_s1, %s579_s1, %s580_s17  }
  0x34   :  { %569 = dma.done.wait [#allocation3], 512  }
  0x35   :  { %570 = vsyncadd [#allocation3], 4294966784 }
  0x36   :  { %571 = dma.done.wait [#allocation6], 8192  }
  0x37   :  { %572 = vsyncadd [#allocation6], 4294959104  ;;  %v82_v0 = vld [vmem:[#allocation5 + $0x80] sm:$0xff]  ;;  %v83_v1 = vld [vmem:[#allocation5 + $0x88] sm:$0xff] }
  0x38   :  { %v66_v2 = vld [vmem:[#allocation5] sm:$0xff]  ;;  %v392_v3 = vpack.c.bf16 %v83_v1, %v82_v0  ;;  %v67_v4 = vld [vmem:[#allocation5 + $0x8] sm:$0xff]  ;;  %v84_v5 = vld [vmem:[#allocation5 + $0x90] sm:$0xff] }
  0x39   :  { %v85_v6 = vld [vmem:[#allocation5 + $0x98] sm:$0xff]  ;;  %v394_v7 = vpack.c.bf16 %v67_v4, %v66_v2  ;;  %v68_v9 = vld [vmem:[#allocation5 + $0x10] sm:$0xff]  ;;  %v86_v11 = vld [vmem:[#allocation5 + $0xa0] sm:$0xff] }
  0x3a   :  { %v396_v8 = vpack.c.bf16 %v85_v6, %v84_v5  ;;  %v69_v10 = vld [vmem:[#allocation5 + $0x18] sm:$0xff]  ;;  %393 = vmatprep.subr.bf16.mxu0 %v392_v3  ;;  %v87_v12 = vld [vmem:[#allocation5 + $0xa8] sm:$0xff]  ;;  %v70_v15 = vld [vmem:[#allocation5 + $0x20] sm:$0xff] }
  0x3b   :  { %395 = vmatpush3.bf16.msra.mxu0 %v394_v7  ;;  %v398_v13 = vpack.c.bf16 %v69_v10, %v68_v9  ;;  %v400_v14 = vpack.c.bf16 %v87_v12, %v86_v11  ;;  %v71_v16 = vld [vmem:[#allocation5 + $0x28] sm:$0xff]  ;;  %v88_v17 = vld [vmem:[#allocation5 + $0xb0] sm:$0xff]  ;;  %v89_v18 = vld [vmem:[#allocation5 + $0xb8] sm:$0xff] }
  0x3c   :  { %397 = vmatprep.subr.bf16.mxu0 %v396_v8  ;;  %v402_v19 = vpack.c.bf16 %v71_v16, %v70_v15  ;;  %v404_v20 = vpack.c.bf16 %v89_v18, %v88_v17  ;;  %v72_v21 = vld [vmem:[#allocation5 + $0x30] sm:$0xff]  ;;  %v73_v22 = vld [vmem:[#allocation5 + $0x38] sm:$0xff]  ;;  %v90_v23 = vld [vmem:[#allocation5 + $0xc0] sm:$0xff] }
  0x3d   :  { %v91_v24 = vld [vmem:[#allocation5 + $0xc8] sm:$0xff]  ;;  %v74_v26 = vld [vmem:[#allocation5 + $0x40] sm:$0xff]  ;;  %v406_v28 = vpack.c.bf16 %v73_v22, %v72_v21  ;;  %v92_v29 = vld [vmem:[#allocation5 + $0xd0] sm:$0xff] }
  0x3e   :  { %v63_v25 = vld [vmem:[#allocation2 + $0x8] sm:$0xff]  ;;  %v93_v30 = vld [vmem:[#allocation5 + $0xd8] sm:$0xff]  ;;  %v182_v33 = vld [vmem:[#allocation7] sm:$0xff]  ;;  %v408_v34 = vpack.c.bf16 %v91_v24, %v90_v23 }
  0x3f   :  { %399 = vmatpush3.bf16.msra.mxu0 %v398_v13  ;;  %v75_v27 = vld [vmem:[#allocation5 + $0x48] sm:$0xff]  ;;  %169 = vmatprep.mubr.f32.mxu0 %v63_v25  ;;  %v185_v32 = vld [vmem:[#allocation7 + $0x18] sm:$0xff]  ;;  %v184_v36 = vld [vmem:[#allocation7 + $0x10] sm:$0xff]  ;;  %v412_v49 = vpack.c.bf16 %v93_v30, %v92_v29 }
  0x40   :  { %401 = vmatprep.subr.bf16.mxu0 %v400_v14  ;;  %v183_v31 = vld [vmem:[#allocation7 + $0x8] sm:$0xff]  ;;  %v189_v38 = vld [vmem:[#allocation7 + $0x38] sm:$0xff]  ;;  %v426_v39 = vpack.c.bf16 %v184_v36, %v182_v33  ;;  %v186_v41 = vld [vmem:[#allocation7 + $0x20] sm:$0xff]  ;;  %v410_v45 = vpack.c.bf16 %v75_v27, %v74_v26  ;;  %v582_v36 = vmov 0.0  }
  0x41   :  { %v424_v35 = vpack.c.bf16 %v185_v32, %v183_v31  ;;  %v187_v37 = vld [vmem:[#allocation7 + $0x28] sm:$0xff]  ;;  %v188_v42 = vld [vmem:[#allocation7 + $0x30] sm:$0xff]  ;;  %v193_v44 = vld [vmem:[#allocation7 + $0x58] sm:$0xff]  ;;  %290 = vmatprep.mubr.f32.mxu1 %v582_v36 }
  0x42   :  { %v428_v40 = vpack.c.bf16 %v189_v38, %v187_v37  ;;  %v191_v43 = vld [vmem:[#allocation7 + $0x48] sm:$0xff]  ;;  %v76_v46 = vld [vmem:[#allocation5 + $0x50] sm:$0xff]  ;;  %v77_v47 = vld [vmem:[#allocation5 + $0x58] sm:$0xff]  ;;  %v430_v48 = vpack.c.bf16 %v188_v42, %v186_v41 }
  0x43   :  { %403 = vmatpush3.bf16.msra.mxu0 %v402_v19  ;;  %425 = vmatprep.subr.bf16.mxu1 %v424_v35  ;;  %v94_v50 = vld [vmem:[#allocation5 + $0xe0] sm:$0xff]  ;;  %v432_v51 = vpack.c.bf16 %v193_v44, %v191_v43  ;;  %v192_v53 = vld [vmem:[#allocation7 + $0x50] sm:$0xff]  ;;  %v95_v54 = vld [vmem:[#allocation5 + $0xe8] sm:$0xff]  ;;  %v414_v57 = vpack.c.bf16 %v77_v47, %v76_v46 }
  0x44   :  { %405 = vmatprep.subr.bf16.mxu0 %v404_v20  ;;  %427 = vmatpush1.bf16.msra.mxu1 %v426_v39  ;;  %v190_v52 = vld [vmem:[#allocation7 + $0x40] sm:$0xff]  ;;  %v195_v55 = vld [vmem:[#allocation7 + $0x68] sm:$0xff]  ;;  %v197_v56 = vld [vmem:[#allocation7 + $0x78] sm:$0xff]  ;;  %v416_v61 = vpack.c.bf16 %v95_v54, %v94_v50 }
  0x45   :  { %429 = vmatprep.subr.bf16.mxu1 %v428_v40  ;;  %v78_v58 = vld [vmem:[#allocation5 + $0x60] sm:$0xff]  ;;  %v79_v59 = vld [vmem:[#allocation5 + $0x68] sm:$0xff]  ;;  %v434_v60 = vpack.c.bf16 %v192_v53, %v190_v52  ;;  %v96_v62 = vld [vmem:[#allocation5 + $0xf0] sm:$0xff]  ;;  %v436_v63 = vpack.c.bf16 %v197_v56, %v195_v55 }
  0x46   :  { %v194_v0 = vld [vmem:[#allocation7 + $0x60] sm:$0xff]  ;;  %v196_v1 = vld [vmem:[#allocation7 + $0x70] sm:$0xff]  ;;  %v97_v2 = vld [vmem:[#allocation5 + $0xf8] sm:$0xff]  ;;  %v418_v5 = vpack.c.bf16 %v79_v59, %v78_v58 }
  0x47   :  { %407 = vmatpush3.bf16.msra.mxu0 %v406_v28  ;;  %v199_v3 = vld [vmem:[#allocation7 + $0x88] sm:$0xff]  ;;  %v201_v4 = vld [vmem:[#allocation7 + $0x98] sm:$0xff]  ;;  %v80_v6 = vld [vmem:[#allocation5 + $0x70] sm:$0xff]  ;;  %v438_v7 = vpack.c.bf16 %v196_v1, %v194_v0  ;;  %v420_v8 = vpack.c.bf16 %v97_v2, %v96_v62 }
  0x48   :  { %409 = vmatprep.subr.bf16.mxu0 %v408_v34  ;;  %431 = vmatpush1.bf16.msra.mxu1 %v430_v48  ;;  %v81_v9 = vld [vmem:[#allocation5 + $0x78] sm:$0xff]  ;;  %v440_v10 = vpack.c.bf16 %v201_v4, %v199_v3  ;;  %v198_v11 = vld [vmem:[#allocation7 + $0x80] sm:$0xff]  ;;  %v200_v12 = vld [vmem:[#allocation7 + $0x90] sm:$0xff]  ;;  %v216_v48 = vlaneseq }
  0x49   :  { %433 = vmatprep.subr.bf16.mxu1 %v432_v51  ;;  %v203_v13 = vld [vmem:[#allocation7 + $0xa8] sm:$0xff]  ;;  %v205_v14 = vld [vmem:[#allocation7 + $0xb8] sm:$0xff]  ;;  %v422_v15 = vpack.c.bf16 %v81_v9, %v80_v6  ;;  %v442_v16 = vpack.c.bf16 %v200_v12, %v198_v11  ;;  %v202_v18 = vld [vmem:[#allocation7 + $0xa0] sm:$0xff] }
  0x4a   :  { %v444_v17 = vpack.c.bf16 %v205_v14, %v203_v13  ;;  %v204_v19 = vld [vmem:[#allocation7 + $0xb0] sm:$0xff]  ;;  %v62_v20 = vld [vmem:[#allocation2] sm:$0xff]  ;;  %v65_v22 = vld [vmem:[#allocation2 + $0x18] sm:$0xff] }
  0x4b   :  { %411 = vmatpush3.bf16.msra.mxu0 %v410_v45  ;;  %v446_v21 = vpack.c.bf16 %v204_v19, %v202_v18  ;;  %v64_v23 = vld [vmem:[#allocation2 + $0x10] sm:$0xff]  ;;  %v207_v24 = vld [vmem:[#allocation7 + $0xc8] sm:$0xff]  ;;  %v209_v25 = vld [vmem:[#allocation7 + $0xd8] sm:$0xff] }
  0x4c   :  { %413 = vmatprep.subr.bf16.mxu0 %v412_v49  ;;  %435 = vmatpush1.bf16.msra.mxu1 %v434_v60  ;;  %v448_v26 = vpack.c.bf16 %v209_v25, %v207_v24  ;;  %v206_v27 = vld [vmem:[#allocation7 + $0xc0] sm:$0xff]  ;;  %v208_v28 = vld [vmem:[#allocation7 + $0xd0] sm:$0xff]  ;;  %v211_v30 = vld [vmem:[#allocation7 + $0xe8] sm:$0xff]  ;;  %v217_v49 = vshrl.u32 %v216_v48, 7 }
  0x4d   :  { %437 = vmatprep.subr.bf16.mxu1 %v436_v63  ;;  %v450_v29 = vpack.c.bf16 %v208_v28, %v206_v27  ;;  %v213_v31 = vld [vmem:[#allocation7 + $0xf8] sm:$0xff]  ;;  %v210_v33 = vld [vmem:[#allocation7 + $0xe0] sm:$0xff]  ;;  %v212_v34 = vld [vmem:[#allocation7 + $0xf0] sm:$0xff] }
  0x4e   :  { %v452_v32 = vpack.c.bf16 %v213_v31, %v211_v30  ;;  %v454_v35 = vpack.c.bf16 %v212_v34, %v210_v33  ;;  %v349_v38 = vld [vmem:[%s679_s2] ss:$0 sm:$0xff]  ;;  %v218_v50 = vsub.s32 0, %v217_v49  ;;  %v222_v52 = vsub.s32 1, %v217_v49  ;;  %s583_s2 = smov [#allocation8]  }
  0x4f   :  { %415 = vmatpush3.bf16.msra.mxu0 %v414_v57  ;;  %v214_v51 = vld [vmem:[%s681_s4] sm:$0x3]  ;;  %s336_s4 = sshll.u32 %s583_s2, 4  ;;  %s337_s4 = int_to_ptr.vmem [resolvable:$true] %s336_s4 }
  0x50   :  { %417 = vmatprep.subr.bf16.mxu0 %v416_v61  ;;  %439 = vmatpush1.bf16.msra.mxu1 %v438_v7  ;;  %v219_v53 = vrot.slane %v214_v51, %v218_v50  ;;  %v223_v54 = vrot.slane %v214_v51, %v222_v52  ;;  %s547_s9 = scalar_lea.vmem %s337_s4, 512  ;;  %p552_p11 = scmp.lt.s32.totalorder %s337_s4, %s337_s4 }
  0x51   :  { %441 = vmatprep.subr.bf16.mxu1 %v440_v10  ;;  %p548_p10 = scmp.ne.s32.totalorder %s337_s4, %s547_s9  ;;  %p553_p12 = scmp.lt.s32.totalorder %s547_s9, %s547_s9 }
  0x53   :  { %419 = vmatpush3.bf16.msra.mxu0 %v418_v5  ;;  %p554_p13 = por %p553_p12, %p552_p11 }
  0x54   :  { %421 = vmatprep.subr.bf16.mxu0 %v420_v8  ;;  %443 = vmatpush1.bf16.msra.mxu1 %v442_v16 }
  0x55   :  { %445 = vmatprep.subr.bf16.mxu1 %v444_v17  ;;  %p555_p0 = pnand %p554_p13, %p548_p10 }
  0x57   :  { %423 = vmatpush3.bf16.msra.mxu0 %v422_v15 }
  0x58   :  { %447 = vmatpush1.bf16.msra.mxu1 %v446_v21 }
  0x59   :  { %449 = vmatprep.subr.bf16.mxu1 %v448_v26 }
  0x5a   :  { %170 = vmatmul.mubr.f32.vlgmr.msra.gmra.mrb[0].mxu0 %v62_v20 }
  0x5b   :  { %174 = vmatprep.mubr.f32.mxu0 %v65_v22 }
  0x5c   :  { %451 = vmatpush1.bf16.msra.mxu1 %v450_v29 }
  0x5d   :  { %453 = vmatprep.subr.bf16.mxu1 %v452_v32 }
  0x5e   :  { %175 = vmatmul.mubr.f32.gmra.mrb[2].mxu0 %v64_v23 }
  0x60   :  { %455 = vmatpush1.bf16.msra.mxu1 %v454_v35 }
 0x12d   :  { %v386_v37 = vpop.f32.mrb[0].mxu0 }
 0x12e   :  { %v387_v39 = vpop.f32.mrb[1].mxu0 }
 0x12f   :  { %v388_v40 = vadd.f32 %v387_v39, %v386_v37 }
 0x131   :  { %v172_v41 = vadd.f32 %v388_v40, %v349_v38  ;;  %v389_v42 = vpop.f32.mrb[2].mxu0 }
 0x132   :  { %v390_v43 = vpop.f32.mrb[3].mxu0 }
 0x133   :  { %v180_v44 = vmax.f32 %v172_v41, 0.0  ;;  %v391_v45 = vadd.f32 %v390_v43, %v389_v42 }
 0x135   :  { %v177_v46 = vadd.f32 %v391_v45, %v349_v38  ;;  %291 = vmatmul.mubr.f32.vlgmr.msra.gmra.mrb[0].mxu1 %v180_v44 }
 0x136   :  { %296 = vmatprep.mubr.f32.mxu1 %v582_v36 }
 0x137   :  { %v181_v47 = vmax.f32 %v177_v46, 0.0 }
 0x139   :  { %297 = vmatmul.mubr.f32.gmra.mrb[2].mxu1 %v181_v47 }
 0x208   :  { %v292_v55 = vpop.f32.mrb[0].mxu1 }
 0x209   :  { %v293_v56 = vadd.f32 %v292_v55, %v219_v53  ;;  %v294_v57 = vpop.f32.mrb[1].mxu1 }
 0x20a   :  { %v295_v58 = vadd.f32 %v294_v57, %v223_v54 }
 0x20b   :  { %v350_v59 = vmul.f32 -1.442695, %v293_v56 }
 0x20c   :  { %v351_v60 = vmul.f32 -1.442695, %v295_v58  ;;  %v298_v61 = vpop.f32.mrb[2].mxu1 }
 0x20d   :  { %465 = vpow2.f32 %v350_v59  ;;  %v299_v62 = vadd.f32 %v298_v61, %v219_v53  ;;  %v300_v63 = vpop.f32.mrb[3].mxu1 }
 0x20e   :  { %467 = vpow2.f32 %v351_v60  ;;  %v301_v0 = vadd.f32 %v300_v63, %v223_v54 }
 0x20f   :  { %v352_v1 = vmul.f32 -1.442695, %v299_v62 }
 0x210   :  { %v353_v2 = vmul.f32 -1.442695, %v301_v0 }
 0x211   :  { %469 = vpow2.f32 %v352_v1 }
 0x212   :  { %471 = vpow2.f32 %v353_v2 }
 0x217   :  { %v466_v3 = vpop.eup %465 }
 0x218   :  { %v468_v4 = vpop.eup %467  ;;  %v315_v5 = vadd.f32 1.0, %v466_v3 }
 0x219   :  { %v316_v6 = vadd.f32 1.0, %v468_v4 }
 0x21a   :  { %473 = vrcp.f32 %v315_v5 }
 0x21b   :  { %v470_v7 = vpop.eup %469  ;;  %475 = vrcp.f32 %v316_v6 }
 0x21c   :  { %v472_v8 = vpop.eup %471  ;;  %v317_v9 = vadd.f32 1.0, %v470_v7 }
 0x21d   :  { %v318_v10 = vadd.f32 1.0, %v472_v8 }
 0x21e   :  { %477 = vrcp.f32 %v317_v9 }
 0x21f   :  { %479 = vrcp.f32 %v318_v10 }
 0x224   :  { %v474_v11 = vpop.eup %473 }
 0x225   :  { %v476_v12 = vpop.eup %475  ;;  %327 = vst [vmem:[#allocation8] sm:$0xff] %v474_v11 }
 0x226   :  { %328 = vst [vmem:[#allocation8 + $0x8] sm:$0xff] %v476_v12 }
 0x228   :  { %v478_v13 = vpop.eup %477 }
 0x229   :  { %v480_v14 = vpop.eup %479  ;;  %329 = vst [vmem:[#allocation8 + $0x10] sm:$0xff] %v478_v13 }
 0x22a   :  { %330 = vst [vmem:[#allocation8 + $0x18] sm:$0xff] %v480_v14 }
 0x22b   :  { %558 = shalt.err (!%p555_p0)
}
 0x22c   :  { %s559_s12 = scalar_lea.hbm %s682_s5, 512 }
 0x22d   :  { %p560_p1 = scmp.ne.s32.totalorder %s682_s5, %s559_s12  ;;  %p563_p2 = scmp.lt.u32.totalorder %s559_s12, %s682_s5 }
 0x22f   :  { %p565_p3 = pnand %p563_p2, %p560_p1 }
 0x231   :  { %568 = shalt.err (!%p565_p3)
}
 0x232   :  { %342 = dma.vmem_to_hbm [thread:$0]  %s337_s4, 512, %s682_s5, [#allocation4], %s579_s1, %s579_s1, %s580_s17  }
 0x233   :  { %573 = dma.done.wait [#allocation4], 512  }
 0x234   :  { %574 = vsyncadd [#allocation4], 4294966784 }
 0x235   :  { %346 = vsyncpa [#allocation3], 1 }
 0x236   :  { %347 = vsyncpa [#allocation6], 1 }
 0x237   :  { %348 = vsyncpa [#allocation4], 1 }

</bundles_post_ra>
